<compile_context>
chip_gen: v7x
topology: tpu7x:2x2x1
jax: 0.10.0
libtpu: 0.0.40
codegen_flags: <defaults>
</compile_context>

<pallas_src>
import functools

import jax
import jax.numpy as jnp
from jax.experimental import pallas as pl
from jax.experimental.pallas import tpu as pltpu


def _round_up(x, m):
    return ((x + m - 1) // m) * m


def _sas_kernel(discrete, seq_obs_dim, s_embed_dim,
                x_ref, w_state_ref, b_state_ref, w_act_ref,
                w_tr_s_ref, w_tr_a_ref, b_tr_ref, out_ref):
    # Fused input slab: [ state_x | eps | act_x(padded) ]
    x = x_ref[...]                                            # (TM, in_width)
    state_x = x[:, :seq_obs_dim]
    eps = x[:, seq_obs_dim:seq_obs_dim + s_embed_dim].astype(jnp.float32)
    act_x = x[:, seq_obs_dim + s_embed_dim:]

    # GaussianMLP: fused [mu | log_var] head (one MXU matmul), reparam sample, Tanh.
    mu_lv = (jnp.dot(state_x, w_state_ref[...], preferred_element_type=jnp.float32)
             + b_state_ref[...].astype(jnp.float32))
    mu = mu_lv[:, :s_embed_dim]
    log_var = mu_lv[:, s_embed_dim:]
    state_emb = jnp.tanh(mu + jnp.exp(0.5 * log_var) * eps)

    # linear_act (no bias) + Tanh.
    act_emb = jnp.tanh(jnp.dot(act_x, w_act_ref[...],
                               preferred_element_type=jnp.float32))

    # transition(cat([state_emb, act_emb])) == split-weight sum of two matmuls.
    w_dtype = w_tr_s_ref.dtype
    out = (jnp.dot(state_emb.astype(w_dtype), w_tr_s_ref[...],
                   preferred_element_type=jnp.float32)
           + jnp.dot(act_emb.astype(w_dtype), w_tr_a_ref[...],
                     preferred_element_type=jnp.float32)
           + b_tr_ref[...].astype(jnp.float32))

    if discrete:
        # LogSoftmax(dim=-1) over the true obs_dim columns (no lane padding here).
        m = jnp.max(out, axis=-1, keepdims=True)
        lse = m + jnp.log(jnp.sum(jnp.exp(out - m), axis=-1, keepdims=True))
        out = out - lse
    # else: Identity

    out_ref[...] = out.astype(out_ref.dtype)


def sas_embedder_forward(state_x, act_x, eps,
                         w_mu, b_mu, w_lv, b_lv,
                         w_act, w_tr_s, w_tr_a, b_tr,
                         *, state_space_type="continuous", block_m=1024):
    """Pallas wrapper. Weights are in [in, out] layout; biases are [1, out]."""
    B = state_x.shape[0]
    seq_obs_dim, s_embed_dim = w_mu.shape
    act_dim, _ = w_act.shape
    obs_dim = b_tr.shape[-1]
    discrete = (state_space_type == "discrete")
    dt = state_x.dtype

    # --- weight prep (layout plumbing, fused away under jit) -----------------
    # Fused GaussianMLP head: one [seq_obs, 2*s_embed] weight / [1, 2*s_embed] bias.
    w_state = jnp.concatenate([w_mu, w_lv], axis=1)
    b_state = jnp.concatenate([b_mu.reshape(1, -1), b_lv.reshape(1, -1)], axis=1)

    # Pad action features to a multiple of 8 (zero-padded weight rows are inert).
    act_pad = _round_up(act_dim, 8)
    if act_pad != act_dim:
        act_x = jnp.pad(act_x, ((0, 0), (0, act_pad - act_dim)))
        w_act = jnp.pad(w_act, ((0, act_pad - act_dim), (0, 0)))
    b_tr2 = b_tr.reshape(1, -1)

    # Single fused input slab -> one aligned input DMA per batch tile.
    x = jnp.concatenate(
        [state_x.astype(dt), eps.astype(dt), act_x.astype(dt)], axis=1)
    in_width = x.shape[1]

    # --- batch tiling ---------------------------------------------------------
    tm = min(block_m, _round_up(B, 8))
    b_pad = _round_up(B, tm)
    if b_pad != B:
        x = jnp.pad(x, ((0, b_pad - B), (0, 0)))
    grid = (b_pad // tm,)

    def resident(a):
        nd = a.ndim
        return pl.BlockSpec(a.shape, lambda i, _nd=nd: (0,) * _nd)

    weights = (w_state, b_state, w_act, w_tr_s, w_tr_a, b_tr2)

    out = pl.pallas_call(
        functools.partial(_sas_kernel, discrete, seq_obs_dim, s_embed_dim),
        out_shape=jax.ShapeDtypeStruct((b_pad, obs_dim), dt),
        grid=grid,
        in_specs=[pl.BlockSpec((tm, in_width), lambda i: (i, 0))]
                 + [resident(a) for a in weights],
        out_specs=pl.BlockSpec((tm, obs_dim), lambda i: (i, 0)),
        compiler_params=pltpu.CompilerParams(
            dimension_semantics=("parallel",)),
    )(x, *weights)

    return out[:B]


def _reference_forward(state_x, act_x, eps,
                       w_mu, b_mu, w_lv, b_lv,
                       w_act, w_tr_s, w_tr_a, b_tr,
                       state_space_type="continuous"):
    hp = jax.lax.Precision.HIGHEST
    mu = jnp.dot(state_x, w_mu, precision=hp) + b_mu
    log_var = jnp.dot(state_x, w_lv, precision=hp) + b_lv
    state_emb = jnp.tanh(mu + jnp.exp(0.5 * log_var) * eps)
    act_emb = jnp.tanh(jnp.dot(act_x, w_act, precision=hp))
    out = (jnp.dot(state_emb, w_tr_s, precision=hp)
           + jnp.dot(act_emb, w_tr_a, precision=hp) + b_tr)
    if state_space_type == "discrete":
        out = jax.nn.log_softmax(out, axis=-1)
    return out


if __name__ == "__main__":
    # Shapes consistent with the module's __init__ (small).
    obs_dim = 8
    sequence_length = 4
    seq_obs_dim = obs_dim * sequence_length      # 32
    act_dim = 6
    s_embed_dim = 16
    a_embed_dim = 8

    key = jax.random.PRNGKey(0)
    ks = jax.random.split(key, 16)

    # Deterministic synthetic parameters (stored directly in [in, out] layout).
    w_mu = 0.1 * jax.random.normal(ks[0], (seq_obs_dim, s_embed_dim), jnp.float32)
    b_mu = 0.1 * jax.random.normal(ks[1], (1, s_embed_dim), jnp.float32)
    w_lv = 0.1 * jax.random.normal(ks[2], (seq_obs_dim, s_embed_dim), jnp.float32)
    b_lv = 0.1 * jax.random.normal(ks[3], (1, s_embed_dim), jnp.float32)
    w_act = 0.1 * jax.random.normal(ks[4], (act_dim, a_embed_dim), jnp.float32)
    # transition weight split: first s_embed_dim rows act on state_emb, rest on act_emb.
    w_tr_s = 0.1 * jax.random.normal(ks[5], (s_embed_dim, obs_dim), jnp.float32)
    w_tr_a = 0.1 * jax.random.normal(ks[6], (a_embed_dim, obs_dim), jnp.float32)
    b_tr = 0.1 * jax.random.normal(ks[7], (1, obs_dim), jnp.float32)
    params = (w_mu, b_mu, w_lv, b_lv, w_act, w_tr_s, w_tr_a, b_tr)

    # ---- Case 1: small batch, continuous (Identity activation), single tile ----
    batch1 = 8
    state_x1 = jax.random.normal(ks[8], (batch1, seq_obs_dim), jnp.float32)
    act_x1 = jax.random.normal(ks[9], (batch1, act_dim), jnp.float32)
    eps1 = jax.random.normal(ks[10], (batch1, s_embed_dim), jnp.float32)

    fwd_cont = jax.jit(functools.partial(
        sas_embedder_forward, state_space_type="continuous", block_m=1024))
    out1 = jax.block_until_ready(fwd_cont(state_x1, act_x1, eps1, *params))
    ref1 = _reference_forward(state_x1, act_x1, eps1, *params,
                              state_space_type="continuous")
    assert out1.shape == (batch1, obs_dim)
    assert jnp.allclose(out1, ref1, atol=2e-5, rtol=2e-5), "continuous mismatch"

    # ---- Case 2: ragged batch, discrete (LogSoftmax), multi-tile grid ----
    batch2 = 300
    state_x2 = jax.random.normal(ks[11], (batch2, seq_obs_dim), jnp.float32)
    act_x2 = jax.random.normal(ks[12], (batch2, act_dim), jnp.float32)
    eps2 = jax.random.normal(ks[13], (batch2, s_embed_dim), jnp.float32)

    fwd_disc = jax.jit(functools.partial(
        sas_embedder_forward, state_space_type="discrete", block_m=128))
    out2 = jax.block_until_ready(fwd_disc(state_x2, act_x2, eps2, *params))
    ref2 = _reference_forward(state_x2, act_x2, eps2, *params,
                              state_space_type="discrete")
    assert out2.shape == (batch2, obs_dim)
    assert jnp.allclose(out2, ref2, atol=2e-5, rtol=2e-5), "discrete mismatch"

    # TODO(synk): getter/utility methods (get_*_embedding, update_embeddings)
    # are not part of forward() and are not kernelized.
    print("KERNEL_OK")
</pallas_src>

<mosaic_0001>
module attributes {stable_mosaic.version = 11 : i64} {
  func.func @_sas_kernel(%arg0: i32, %arg1: memref<8x56xf32, #tpu.memory_space<vmem>>, %arg2: memref<32x32xf32, #tpu.memory_space<vmem>>, %arg3: memref<1x32xf32, #tpu.memory_space<vmem>>, %arg4: memref<8x8xf32, #tpu.memory_space<vmem>>, %arg5: memref<16x8xf32, #tpu.memory_space<vmem>>, %arg6: memref<8x8xf32, #tpu.memory_space<vmem>>, %arg7: memref<1x8xf32, #tpu.memory_space<vmem>>, %arg8: memref<8x8xf32, #tpu.memory_space<vmem>>) attributes {dimension_semantics = [#tpu.dimension_semantics<parallel>], iteration_bounds = array<i64: 1>, scalar_prefetch = 0 : i64, scratch_operands = 0 : i64, tpu.core_type = #tpu.core_type<tc>, window_params = [{transform_indices = @transform_0, window_bounds = array<i64: 8, 56>}, {pipeline_mode = #tpu.pipeline_mode<synchronous>, transform_indices = @transform_1, window_bounds = array<i64: 32, 32>}, {pipeline_mode = #tpu.pipeline_mode<synchronous>, transform_indices = @transform_2, window_bounds = array<i64: 1, 32>}, {pipeline_mode = #tpu.pipeline_mode<synchronous>, transform_indices = @transform_3, window_bounds = array<i64: 8, 8>}, {pipeline_mode = #tpu.pipeline_mode<synchronous>, transform_indices = @transform_4, window_bounds = array<i64: 16, 8>}, {pipeline_mode = #tpu.pipeline_mode<synchronous>, transform_indices = @transform_5, window_bounds = array<i64: 8, 8>}, {pipeline_mode = #tpu.pipeline_mode<synchronous>, transform_indices = @transform_6, window_bounds = array<i64: 1, 8>}, {transform_indices = @transform_7, window_bounds = array<i64: 8, 8>}]} {
    %c0 = arith.constant 0 : index
    %c0_0 = arith.constant 0 : index
    %0 = vector.load %arg1[%c0, %c0_0] : memref<8x56xf32, #tpu.memory_space<vmem>>, vector<8x56xf32>
    %1 = vector.extract_strided_slice %0 {offsets = [0, 0], sizes = [8, 32], strides = [1, 1]} : vector<8x56xf32> to vector<8x32xf32>
    %2 = vector.extract_strided_slice %0 {offsets = [0, 32], sizes = [8, 16], strides = [1, 1]} : vector<8x56xf32> to vector<8x16xf32>
    %3 = vector.extract_strided_slice %0 {offsets = [0, 48], sizes = [8, 8], strides = [1, 1]} : vector<8x56xf32> to vector<8x8xf32>
    %c0_1 = arith.constant 0 : index
    %c0_2 = arith.constant 0 : index
    %4 = vector.load %arg2[%c0_1, %c0_2] : memref<32x32xf32, #tpu.memory_space<vmem>>, vector<32x32xf32>
    %cst = arith.constant dense<0.000000e+00> : vector<8x32xf32>
    %5 = tpu.matmul %1, %4, %cst {dimension_numbers = #tpu.dot_dimension_numbers<[1], [0], [0], [1], [0, 0, 1, 1], [], []>} : vector<8x32xf32>, vector<32x32xf32>, vector<8x32xf32> -> vector<8x32xf32>
    %c0_3 = arith.constant 0 : index
    %c0_4 = arith.constant 0 : index
    %6 = vector.load %arg3[%c0_3, %c0_4] : memref<1x32xf32, #tpu.memory_space<vmem>>, vector<1x32xf32>
    %7 = vector.broadcast %6 : vector<1x32xf32> to vector<8x32xf32>
    %8 = arith.addf %5, %7 : vector<8x32xf32>
    %9 = vector.extract_strided_slice %8 {offsets = [0, 0], sizes = [8, 16], strides = [1, 1]} : vector<8x32xf32> to vector<8x16xf32>
    %10 = vector.extract_strided_slice %8 {offsets = [0, 16], sizes = [8, 16], strides = [1, 1]} : vector<8x32xf32> to vector<8x16xf32>
    %cst_5 = arith.constant 5.000000e-01 : f32
    %11 = vector.broadcast %cst_5 : f32 to vector<8x16xf32>
    %12 = arith.mulf %11, %10 : vector<8x16xf32>
    %13 = math.exp %12 : vector<8x16xf32>
    %14 = arith.mulf %13, %2 : vector<8x16xf32>
    %15 = arith.addf %9, %14 : vector<8x16xf32>
    %16 = math.tanh %15 : vector<8x16xf32>
    %c0_6 = arith.constant 0 : index
    %c0_7 = arith.constant 0 : index
    %17 = vector.load %arg4[%c0_6, %c0_7] : memref<8x8xf32, #tpu.memory_space<vmem>>, vector<8x8xf32>
    %cst_8 = arith.constant dense<0.000000e+00> : vector<8x8xf32>
    %18 = tpu.matmul %3, %17, %cst_8 {dimension_numbers = #tpu.dot_dimension_numbers<[1], [0], [0], [1], [0, 0, 1, 1], [], []>} : vector<8x8xf32>, vector<8x8xf32>, vector<8x8xf32> -> vector<8x8xf32>
    %19 = math.tanh %18 : vector<8x8xf32>
    %c0_9 = arith.constant 0 : index
    %c0_10 = arith.constant 0 : index
    %20 = vector.load %arg5[%c0_9, %c0_10] : memref<16x8xf32, #tpu.memory_space<vmem>>, vector<16x8xf32>
    %cst_11 = arith.constant dense<0.000000e+00> : vector<8x8xf32>
    %21 = tpu.matmul %16, %20, %cst_11 {dimension_numbers = #tpu.dot_dimension_numbers<[1], [0], [0], [1], [0, 0, 1, 1], [], []>} : vector<8x16xf32>, vector<16x8xf32>, vector<8x8xf32> -> vector<8x8xf32>
    %c0_12 = arith.constant 0 : index
    %c0_13 = arith.constant 0 : index
    %22 = vector.load %arg6[%c0_12, %c0_13] : memref<8x8xf32, #tpu.memory_space<vmem>>, vector<8x8xf32>
    %cst_14 = arith.constant dense<0.000000e+00> : vector<8x8xf32>
    %23 = tpu.matmul %19, %22, %cst_14 {dimension_numbers = #tpu.dot_dimension_numbers<[1], [0], [0], [1], [0, 0, 1, 1], [], []>} : vector<8x8xf32>, vector<8x8xf32>, vector<8x8xf32> -> vector<8x8xf32>
    %24 = arith.addf %21, %23 : vector<8x8xf32>
    %c0_15 = arith.constant 0 : index
    %c0_16 = arith.constant 0 : index
    %25 = vector.load %arg7[%c0_15, %c0_16] : memref<1x8xf32, #tpu.memory_space<vmem>>, vector<1x8xf32>
    %26 = vector.broadcast %25 : vector<1x8xf32> to vector<8x8xf32>
    %27 = arith.addf %24, %26 : vector<8x8xf32>
    %c0_17 = arith.constant 0 : index
    %c0_18 = arith.constant 0 : index
    %28 = vector.load %arg8[%c0_17, %c0_18] : memref<8x8xf32, #tpu.memory_space<vmem>>, vector<8x8xf32>
    tpu.vector_store %arg8[%c0_17, %c0_18], %27 {strides = array<i32>} : memref<8x8xf32, #tpu.memory_space<vmem>>, vector<8x8xf32>,
    return
  }
  func.func @transform_0(%arg0: i32) -> (i32, i32) {
    %c0_i32 = arith.constant 0 : i32
    %c0_i32_0 = arith.constant 0 : i32
    return %arg0, %c0_i32 : i32, i32
  }
  func.func @transform_1(%arg0: i32) -> (i32, i32) {
    %c0_i32 = arith.constant 0 : i32
    %c0_i32_0 = arith.constant 0 : i32
    %c0_i32_1 = arith.constant 0 : i32
    return %c0_i32, %c0_i32_0 : i32, i32
  }
  func.func @transform_2(%arg0: i32) -> (i32, i32) {
    %c0_i32 = arith.constant 0 : i32
    %c0_i32_0 = arith.constant 0 : i32
    %c0_i32_1 = arith.constant 0 : i32
    return %c0_i32, %c0_i32_0 : i32, i32
  }
  func.func @transform_3(%arg0: i32) -> (i32, i32) {
    %c0_i32 = arith.constant 0 : i32
    %c0_i32_0 = arith.constant 0 : i32
    %c0_i32_1 = arith.constant 0 : i32
    return %c0_i32, %c0_i32_0 : i32, i32
  }
  func.func @transform_4(%arg0: i32) -> (i32, i32) {
    %c0_i32 = arith.constant 0 : i32
    %c0_i32_0 = arith.constant 0 : i32
    %c0_i32_1 = arith.constant 0 : i32
    return %c0_i32, %c0_i32_0 : i32, i32
  }
  func.func @transform_5(%arg0: i32) -> (i32, i32) {
    %c0_i32 = arith.constant 0 : i32
    %c0_i32_0 = arith.constant 0 : i32
    %c0_i32_1 = arith.constant 0 : i32
    return %c0_i32, %c0_i32_0 : i32, i32
  }
  func.func @transform_6(%arg0: i32) -> (i32, i32) {
    %c0_i32 = arith.constant 0 : i32
    %c0_i32_0 = arith.constant 0 : i32
    %c0_i32_1 = arith.constant 0 : i32
    return %c0_i32, %c0_i32_0 : i32, i32
  }
  func.func @transform_7(%arg0: i32) -> (i32, i32) {
    %c0_i32 = arith.constant 0 : i32
    %c0_i32_0 = arith.constant 0 : i32
    return %arg0, %c0_i32 : i32, i32
  }
}

</mosaic_0001>

<bundles_post_ra>
// kernel: sas_embedder_forward.1
= control target key start
LH: loop header
LB: loop body
LE: loop exit
PB: predicated region body
PF: predicated region fallthrough
CT: control target
= control target key end

     0   :  { %v467_v3 = vmov 0.0|0.0   ;;  %vm468_vm0 = vmmov 0   ;;  %v469_v6 = vmov 0.0   ;;  %s470_s13 = smov 80   ;;  %s565_s0 = inlined_call_operand.vmem [shape: f32[8,56], index: 0, kind: input, shape index: {}]   ;;  %s566_s1 = inlined_call_operand.vmem [shape: f32[32,32], index: 1, kind: input, shape index: {}]   ;;  %s567_s2 = inlined_call_operand.vmem [shape: f32[1,32], index: 2, kind: input, shape index: {}]   ;;  %s568_s3 = inlined_call_operand.vmem [shape: f32[8,8], index: 3, kind: input, shape index: {}]   ;;  %s569_s4 = inlined_call_operand.vmem [shape: f32[16,8], index: 4, kind: input, shape index: {}]   ;;  %s570_s5 = inlined_call_operand.vmem [shape: f32[8,8], index: 5, kind: input, shape index: {}]   ;;  %s571_s6 = inlined_call_operand.vmem [shape: f32[1,8], index: 6, kind: input, shape index: {}]   ;;  %s572_s7 = inlined_call_operand.hbm [shape: f32[8,8], index: 7, kind: output, shape index: {}]  }
   0x1   :  { %v28_v0 = vld [vmem:[%s566_s1] sm:$0xff]  ;;  %v29_v1 = vld [vmem:[%s566_s1 + $0x8] sm:$0xff]  ;;  %v30_v2 = vld [vmem:[%s566_s1 + $0x10] sm:$0xff]  ;;  %422 = vmatprep.subr.bf16.mxu0 %v467_v3  ;;  %402 = vmatprep.mubr.msk.f32.mxu0 %vm468_vm0, %v469_v6 }
   0x2   :  { %v423_v4 = vpack.c.bf16 %v29_v1, %v28_v0  ;;  %v31_v5 = vld [vmem:[%s566_s1 + $0x18] sm:$0xff]  ;;  %v27_v7 = vld [vmem:[%s565_s0] sm:$0xff]  ;;  %405 = vmatprep.subr.mxu1 %v469_v6 }
   0x3   :  { %v126_v8 = vld [vmem:[%s568_s3] sm:$0xff]  ;;  %127 = vrot.lane.b32.xlu0 %v27_v7, %s470_s13 }
   0x4   :  { %12 = vsyncpa [#allocation3], 0  ;;  %424 = vmatpush3.bf16.msra.mxu0 %v423_v4  ;;  %v426_v9 = vpack.c.bf16 %v31_v5, %v30_v2  ;;  %406 = vmatpush3.msra.mxu1 %v126_v8  ;;  %s471_s1 = smov 112   ;;  %vm39_vm1 = vcmask 261120   ;;  %vm129_vm2 = vcmask 64512   ;;  %v205_v17 = vld [vmem:[%s570_s5] sm:$0xff] }
   0x5   :  { %425 = vmatprep.subr.bf16.mxu0 %v467_v3  ;;  %407 = vmatprep.mubr.msk.f32.mxu1 %vm468_vm0, %v469_v6  ;;  %v376_v11 = vld [vmem:[%s567_s2] ss:$0 sm:$0xff]  ;;  %v204_v24 = vld [vmem:[%s569_s4 + $0x8] sm:$0xff]  ;;  %vm279_vm3 = vcmask 130048  }
   0x6   :  { %410 = vmatprep.subr.mxu1 %v469_v6  ;;  %v203_v23 = vld [vmem:[%s569_s4] sm:$0xff]  ;;  %s472_s4 = smov [#allocation2]  }
   0x7   :  { %116 = vrot.lane.b32.xlu0 %v27_v7, %s471_s1  ;;  %v429_v25 = vpack.c.bf16 %v204_v24, %v203_v23  ;;  %v381_v33 = vld [vmem:[%s571_s6] ss:$0 sm:$0xff]  ;;  %s368_s20 = sshll.u32 %s472_s4, 4  ;;  %s369_s20 = int_to_ptr.vmem [resolvable:$true] %s368_s20 }
   0x8   :  { %427 = vmatpush3.bf16.msra.mxu0 %v426_v9  ;;  %s443_s21 = scalar_lea.vmem %s369_s20, 128  ;;  %p448_p1 = scmp.lt.s32.totalorder %s369_s20, %s369_s20 }
   0x9   :  { %p444_p0 = scmp.ne.s32.totalorder %s369_s20, %s443_s21  ;;  %p449_p2 = scmp.lt.s32.totalorder %s443_s21, %s443_s21 }
   0xb   :  { %403 = vmatmul.mubr.msk.f32.vlgmr.msra.gmra.mrb[0].mxu0 %vm39_vm1, %v27_v7  ;;  %p450_p3 = por %p449_p2, %p448_p1 }
   0xd   :  { %p451_p4 = pnand %p450_p3, %p444_p0 }
  0x75   :  { %v128_v10 = vpop.permute.xlu0 %127 }
  0x76   :  { %408 = vmatmul.mubr.msk.f32.vlgmr.msra.gmra.mrb[0].mxu1 %vm129_vm2, %v128_v10 }
  0x77   :  { %412 = vmatprep.mubr.msk.f32.mxu1 %vm468_vm0, %v469_v6  ;;  %411 = vmatpush3.msra.mxu1 %v205_v17 }
  0x78   :  { %428 = vmatprep.subr.bf16.mxu1 %v467_v3 }
  0x79   :  { %v117_v18 = vpop.permute.xlu0 %116 }
  0xde   :  { %v109_v12 = vpop.f32.mrb[0].mxu0 }
  0xdf   :  { %v110_v13 = vadd.f32 %v376_v11, %v109_v12  ;;  %v404_v14 = vpop.f32.mrb[1].mxu0 }
  0xe1   :  { %v113_v15 = vmul.f32 0.5, %v110_v13 }
  0xe3   :  { %v114_v16 = vmul.f32 1.442695, %v113_v15 }
  0xe5   :  { %437 = vpow2.f32 %v114_v16 }
  0xef   :  { %v438_v19 = vpop.eup %437 }
  0xf0   :  { %v119_v20 = vmul.f32 %v438_v19, %v117_v18 }
  0xf2   :  { %121 = vrot.lane.b32.xlu1 %v119_v20, %s471_s1 }
 0x149   :  { %v198_v21 = vpop.f32.mrb[0].mxu1 }
 0x14a   :  { %439 = vtanh.f32 %v198_v21  ;;  %v409_v22 = vpop.f32.mrb[1].mxu1 }
 0x154   :  { %v440_v26 = vpop.eup %439 }
 0x155   :  { %413 = vmatmul.mubr.msk.f32.vlgmr.msra.gmra.mrb[2].mxu1 %vm129_vm2, %v440_v26 }
 0x156   :  { %430 = vmatpush3.bf16.msra.mxu1 %v429_v25  ;;  %419 = vmatprep.mubr.msk.f32.mxu1 %vm468_vm0, %v469_v6 }
 0x164   :  { %v122_v27 = vpop.permute.xlu1 %121 }
 0x165   :  { %v124_v28 = vadd.f32 %v122_v27, %v110_v13 }
 0x167   :  { %441 = vtanh.f32 %v124_v28 }
 0x171   :  { %v442_v29 = vpop.eup %441 }
 0x172   :  { %420 = vmatmul.mubr.msk.f32.vlgmr.msra.gmra.mrb[4].mxu1 %vm279_vm3, %v442_v29 }
 0x228   :  { %v275_v30 = vpop.f32.mrb[2].mxu1 }
 0x229   :  { %v414_v31 = vpop.f32.mrb[3].mxu1 }
 0x245   :  { %v349_v32 = vpop.f32.mrb[4].mxu1 }
 0x246   :  { %v350_v34 = vadd.f32 %v349_v32, %v275_v30  ;;  %v421_v35 = vpop.f32.mrb[5].mxu1 }
 0x248   :  { %v360_v36 = vadd.f32 %v381_v33, %v350_v34 }
 0x24a   :  { %361 = vst.msk [vmem:[#allocation2] sm:$0xff] %vm129_vm2, %v360_v36 }
 0x24b   :  { %454 = shalt.err (!%p451_p4)
}
 0x24c   :  { %s455_s24 = scalar_lea.hbm %s572_s7, 128 }
 0x24d   :  { %p456_p5 = scmp.ne.s32.totalorder %s572_s7, %s455_s24  ;;  %p459_p6 = scmp.lt.u32.totalorder %s455_s24, %s572_s7 }
 0x24f   :  { %p461_p7 = pnand %p459_p6, %p456_p5 }
 0x251   :  { %464 = shalt.err (!%p461_p7)
}
 0x252   :  { %371 = dma.vmem_to_hbm [thread:$0]  %s369_s20, 128, %s572_s7, [#allocation3]  }
 0x253   :  { %465 = dma.done.wait [#allocation3], 128  }
 0x254   :  { %466 = vsyncadd [#allocation3], 4294967168 }
 0x255   :  { %375 = vsyncpa [#allocation3], 1 }

</bundles_post_ra>
